<compile_context>
chip_gen: v7x
topology: tpu7x:2x2x1
jax: 0.10.0
libtpu: 0.0.40
codegen_flags: <defaults>
</compile_context>

<pallas_src>
import functools
import math

import numpy as np
import jax
import jax.numpy as jnp
from jax import lax
from jax.experimental import pallas as pl
from jax.experimental.pallas import tpu as pltpu

_NEG_INF = -1e30              # large finite negative: exp2 underflows to exactly 0
_LOG2E = 1.4426950408889634   # folded into the Q scale -> base-2 softmax


# --------------------------------------------------------------------------- #
# Kernel 1: fused QKV projection + split heads (+ K transpose)                 #
# --------------------------------------------------------------------------- #
def _qkv_split_heads_kernel(x_ref, w_ref, b_ref, q_ref, k_ref, v_ref,
                            *, n_head, head_dim, q_scale):
    """x(1,tm,C) @ W(C,3C) + b  ->  q/v as (1,H,tm,D), k as (1,H,D,tm)."""
    x = x_ref[0]                                                   # (tm, C)
    qkv = jnp.dot(x, w_ref[...], preferred_element_type=jnp.float32)
    qkv = qkv + b_ref[...]                                         # (tm, 3C) f32
    C = n_head * head_dim

    # Per-head slices; K transposed ONCE here (amortized over all q tiles in
    # kernel 2).  Each of q/k/v is written with a single bulk store.
    q_parts, k_parts, v_parts = [], [], []
    for h in range(n_head):
        lo = h * head_dim
        q_parts.append(qkv[:, lo:lo + head_dim] * q_scale)             # (tm, D)
        k_parts.append(qkv[:, C + lo:C + lo + head_dim].T)             # (D, tm)
        v_parts.append(qkv[:, 2 * C + lo:2 * C + lo + head_dim])       # (tm, D)
    q_ref[0] = jnp.stack(q_parts, axis=0).astype(q_ref.dtype)          # (H, tm, D)
    k_ref[0] = jnp.stack(k_parts, axis=0).astype(k_ref.dtype)          # (H, D, tm)
    v_ref[0] = jnp.stack(v_parts, axis=0).astype(v_ref.dtype)          # (H, tm, D)


# --------------------------------------------------------------------------- #
# Kernel 2: flash attention (base-2 online softmax) + fused output projection  #
# --------------------------------------------------------------------------- #
def _flash_attn_proj_kernel(q_ref, k_ref, v_ref, wp_ref, bp_ref, out_ref,
                            m_scr, l_scr, acc_scr, merged_scr,
                            *, sparse, stride, c):
    n_head = q_ref.shape[1]
    tq = q_ref.shape[2]
    head_dim = q_ref.shape[3]
    tk = k_ref.shape[3]
    qi = pl.program_id(1)
    ki = pl.program_id(2)
    q_start = qi * tq
    k_start = ki * tk

    @pl.when(ki == 0)
    def _init():
        m_scr[...] = jnp.full_like(m_scr, _NEG_INF)
        l_scr[...] = jnp.zeros_like(l_scr)
        acc_scr[...] = jnp.zeros_like(acc_scr)

    # Tiles entirely above the causal diagonal are skipped (their K/V DMA is
    # also skipped via the clamped index_maps in the BlockSpecs).
    @pl.when(k_start <= q_start + (tq - 1))
    def _update():
        q = q_ref[0]                     # (H, tq, D)  pre-scaled by scale*log2(e)
        kT = k_ref[0]                    # (H, D, tk)  lane-dense tk
        v = v_ref[0]                     # (H, tk, D)

        s = jnp.einsum('hqd,hdk->hqk', q, kT,
                       preferred_element_type=jnp.float32)          # (H, tq, tk)

        # Causal / sparse mask from iota — no HBM mask traffic.
        row = q_start + lax.broadcasted_iota(jnp.int32, (tq, tk), 0)
        col = k_start + lax.broadcasted_iota(jnp.int32, (tq, tk), 1)
        keep = col <= row
        if sparse:
            keep = keep & (((col % stride) >= (stride - c))
                           | ((col // stride) == (row // stride)))
        s = jnp.where(keep[None], s, _NEG_INF)

        m_prev = m_scr[...]                                          # (H, tq)
        m_new = jnp.maximum(m_prev, jnp.max(s, axis=-1))
        alpha = jnp.exp2(m_prev - m_new)                             # (H, tq)
        p = jnp.exp2(s - m_new[..., None])                           # (H, tq, tk)

        l_scr[...] = alpha * l_scr[...] + jnp.sum(p, axis=-1)
        acc_scr[...] = alpha[..., None] * acc_scr[...] + jnp.einsum(
            'hqk,hkd->hqd', p.astype(v.dtype), v,
            preferred_element_type=jnp.float32)
        m_scr[...] = m_new

    @pl.when(ki == pl.num_programs(2) - 1)
    def _finalize():
        inv_l = pl.reciprocal(l_scr[...], approx=True)               # (H, tq)
        attn = acc_scr[...] * inv_l[..., None]                       # (H, tq, D) f32
        # merge_heads: one relayout per q tile via a small VMEM staging buffer,
        # then a SINGLE full-depth (tq, C) @ (C, C) projection matmul.
        for h in range(n_head):
            merged_scr[:, h * head_dim:(h + 1) * head_dim] = (
                attn[h].astype(merged_scr.dtype))
        y = jnp.dot(merged_scr[...], wp_ref[...],
                    preferred_element_type=jnp.float32) + bp_ref[...]
        out_ref[0] = y.astype(out_ref.dtype)


# --------------------------------------------------------------------------- #
# Wrapper                                                                      #
# --------------------------------------------------------------------------- #
def _pick_tile(n, preferred):
    if n <= preferred:
        return n
    t = preferred
    while t >= 8:
        if n % t == 0:
            return t
        t //= 2
    return n


def _tpu_vmem_capacity_bytes():
    try:
        info = pltpu.get_tpu_info()
        cap = getattr(info, "vmem_capacity_bytes", None)
        if cap:
            return int(cap)
    except Exception:
        pass
    return 64 << 20      # conservative default (v7x per-TensorCore capacity)


def _vmem_limit_bytes(block_bytes, scratch_bytes=0):
    cap = _tpu_vmem_capacity_bytes()
    est = 2 * block_bytes + scratch_bytes + (8 << 20)   # double-buffer + headroom
    return int(min(max(est, 16 << 20), cap))


def _default_tiles():
    # v5e / v6e (128 MiB VMEM): large tiles amortize per-grid-step overhead.
    # v7x (64 MiB VMEM, 2 TCs): keep 128-sized tiles, rely on 'parallel'
    # megacore sharding of the (batch, q-tile) axes.
    if _tpu_vmem_capacity_bytes() >= (100 << 20):
        return 512, 128, 256     # row_block, q_block, kv_block
    return 256, 128, 128


def linglong_attention(hidden_states, params, *, n_head, layer_idx=0,
                       mode="dense", stride=4, c=1,
                       scale_attn_weights=True,
                       scale_attn_by_inverse_layer_idx=False,
                       q_block=None, kv_block=None, row_block=None):
    """Forward pass of LingLongAttention.

    layer_past=None, attention_mask=None, use_cache=False,
    output_attentions=False, eval-mode dropout.
    params: w_attn (C,3C), b_attn (1,3C), w_proj (C,C), b_proj (1,C)
            following the HF Conv1D convention (y = x @ W + b).
    """
    B, T, C = hidden_states.shape
    head_dim = C // n_head
    assert head_dim * n_head == C
    dtype = hidden_states.dtype
    itemsize = jnp.dtype(dtype).itemsize

    scale = 1.0
    if scale_attn_weights:
        scale /= math.sqrt(head_dim)
    if scale_attn_by_inverse_layer_idx:
        scale /= float(layer_idx + 1)

    sparse = (mode == "sparse" and layer_idx is not None and layer_idx % 2 != 0)

    d_row, d_q, d_kv = _default_tiles()
    tm = _pick_tile(T, row_block or d_row)
    tq = _pick_tile(T, q_block or d_q)
    tk = _pick_tile(T, kv_block or d_kv)

    # ---------------- Kernel 1: QKV projection + split heads ----------------
    qv_shape = jax.ShapeDtypeStruct((B, n_head, T, head_dim), dtype)
    kt_shape = jax.ShapeDtypeStruct((B, n_head, head_dim, T), dtype)   # K^T layout
    k1_block_bytes = itemsize * (tm * C + 3 * C * C + 3 * C + 3 * tm * C)
    # TODO(synk): for very large C the resident (C, 3C) weight block should be
    # column-tiled via an extra grid axis (and constant blocks single-buffered
    # once pl.Buffered(1) pipeline_mode is reliable); fine for typical C.
    qkv_kernel = functools.partial(_qkv_split_heads_kernel, n_head=n_head,
                                   head_dim=head_dim,
                                   q_scale=scale * _LOG2E)
    q, k, v = pl.pallas_call(
        qkv_kernel,
        out_shape=(qv_shape, kt_shape, qv_shape),
        grid_spec=pltpu.PrefetchScalarGridSpec(
            num_scalar_prefetch=0,
            grid=(B, T // tm),
            in_specs=[
                pl.BlockSpec((1, tm, C), lambda b, t: (b, t, 0)),
                pl.BlockSpec((C, 3 * C), lambda b, t: (0, 0)),
                pl.BlockSpec((1, 3 * C), lambda b, t: (0, 0)),
            ],
            out_specs=[
                pl.BlockSpec((1, n_head, tm, head_dim), lambda b, t: (b, 0, t, 0)),
                pl.BlockSpec((1, n_head, head_dim, tm), lambda b, t: (b, 0, 0, t)),
                pl.BlockSpec((1, n_head, tm, head_dim), lambda b, t: (b, 0, t, 0)),
            ]),
        compiler_params=pltpu.CompilerParams(
            dimension_semantics=("parallel", "parallel"),
            vmem_limit_bytes=_vmem_limit_bytes(k1_block_bytes)),
    )(hidden_states, params["w_attn"], params["b_attn"])

    # -------- Kernel 2: flash attention + fused output projection -----------
    def _kv_block(qi, ki):
        # Clamp to the q-tile's diagonal kv block: above-diagonal grid steps
        # revisit the same block index -> no DMA for causally dead K/V tiles.
        return jnp.minimum(ki, (qi * tq + tq - 1) // tk)

    k2_block_bytes = itemsize * (2 * tq * C + 2 * tk * C + C * C + C)
    k2_scratch_bytes = (4 * (2 * n_head * tq + n_head * tq * head_dim)
                        + itemsize * tq * C)
    attn_kernel = functools.partial(_flash_attn_proj_kernel,
                                    sparse=sparse, stride=stride, c=c)
    out = pl.pallas_call(
        attn_kernel,
        out_shape=jax.ShapeDtypeStruct((B, T, C), dtype),
        grid_spec=pltpu.PrefetchScalarGridSpec(
            num_scalar_prefetch=0,
            grid=(B, T // tq, T // tk),
            in_specs=[
                pl.BlockSpec((1, n_head, tq, head_dim),
                             lambda b, qi, ki: (b, 0, qi, 0)),
                pl.BlockSpec((1, n_head, head_dim, tk),
                             lambda b, qi, ki: (b, 0, 0, _kv_block(qi, ki))),
                pl.BlockSpec((1, n_head, tk, head_dim),
                             lambda b, qi, ki: (b, 0, _kv_block(qi, ki), 0)),
                pl.BlockSpec((C, C), lambda b, qi, ki: (0, 0)),
                pl.BlockSpec((1, C), lambda b, qi, ki: (0, 0)),
            ],
            out_specs=pl.BlockSpec((1, tq, C), lambda b, qi, ki: (b, qi, 0)),
            scratch_shapes=[
                pltpu.VMEM((n_head, tq), jnp.float32),             # running max (log2 dom.)
                pltpu.VMEM((n_head, tq), jnp.float32),             # running denominator
                pltpu.VMEM((n_head, tq, head_dim), jnp.float32),   # per-head accumulator
                pltpu.VMEM((tq, C), dtype),                        # merged-heads staging
            ]),
        compiler_params=pltpu.CompilerParams(
            dimension_semantics=("parallel", "parallel", "arbitrary"),
            vmem_limit_bytes=_vmem_limit_bytes(k2_block_bytes, k2_scratch_bytes)),
    )(q, k, v, params["w_proj"], params["b_proj"])
    return out


# --------------------------------------------------------------------------- #
# Pure-JAX reference (mirrors the PyTorch forward)                             #
# --------------------------------------------------------------------------- #
def _dense_causal_mask_np(q_len, k_len):
    return np.tril(np.ones((k_len, k_len), dtype=bool))[k_len - q_len:]


def _sparse_causal_mask_np(q_len, k_len, stride, c):
    layout = np.zeros((k_len, k_len), dtype=bool)
    for idx in range(c):
        layout[:, stride - 1 - idx::stride] = True
    for q_idx in range(k_len):
        row = q_idx // stride
        layout[q_idx, row * stride:(row + 1) * stride] = True
        layout[q_idx, q_idx + 1:] = False
    return layout[k_len - q_len:]


def _reference(hidden_states, params, keep_mask, *, n_head, scale):
    B, T, C = hidden_states.shape
    D = C // n_head
    x = hidden_states.astype(jnp.float32)
    qkv = x @ params["w_attn"].astype(jnp.float32) + params["b_attn"].astype(jnp.float32)
    q, k, v = jnp.split(qkv, 3, axis=-1)

    def split_heads(t):
        return t.reshape(B, T, n_head, D).transpose(0, 2, 1, 3)

    q, k, v = split_heads(q), split_heads(k), split_heads(v)
    s = jnp.einsum("bhtd,bhsd->bhts", q, k) * scale
    s = jnp.where(jnp.asarray(keep_mask)[None, None], s, jnp.finfo(jnp.float32).min)
    p = jax.nn.softmax(s, axis=-1)
    o = jnp.einsum("bhts,bhsd->bhtd", p, v)
    o = o.transpose(0, 2, 1, 3).reshape(B, T, C)
    return o @ params["w_proj"].astype(jnp.float32) + params["b_proj"].astype(jnp.float32)


if __name__ == "__main__":
    # config: n_embd=32, n_head=4, head_dim=8, seq=8, batch=2
    B, T, C, H = 2, 8, 32, 4
    D = C // H

    key = jax.random.PRNGKey(0)
    k_x, k_wa, k_ba, k_wp, k_bp = jax.random.split(key, 5)
    x = jax.random.normal(k_x, (B, T, C), dtype=jnp.float32)
    params = {
        "w_attn": 0.02 * jax.random.normal(k_wa, (C, 3 * C), dtype=jnp.float32),
        "b_attn": 0.02 * jax.random.normal(k_ba, (1, 3 * C), dtype=jnp.float32),
        "w_proj": 0.02 * jax.random.normal(k_wp, (C, C), dtype=jnp.float32),
        "b_proj": 0.02 * jax.random.normal(k_bp, (1, C), dtype=jnp.float32),
    }
    scale = 1.0 / math.sqrt(D)

    # dense path (even layer; 'sparse' mode still uses the dense causal mask)
    out_dense = jax.block_until_ready(
        linglong_attention(x, params, n_head=H, layer_idx=0,
                           mode="sparse", stride=4, c=1))
    ref_dense = _reference(x, params, _dense_causal_mask_np(T, T),
                           n_head=H, scale=scale)
    assert jnp.allclose(out_dense, ref_dense, atol=2e-3, rtol=2e-2), "dense mismatch"

    # sparse path (odd layer in 'sparse' mode)
    out_sparse = jax.block_until_ready(
        linglong_attention(x, params, n_head=H, layer_idx=1,
                           mode="sparse", stride=4, c=1))
    ref_sparse = _reference(x, params, _sparse_causal_mask_np(T, T, 4, 1),
                            n_head=H, scale=scale)
    assert jnp.allclose(out_sparse, ref_sparse, atol=2e-3, rtol=2e-2), "sparse mismatch"

    # bf16 smoke test: bf16 MXU operands, f32 accumulation, bf16 outputs
    x_bf16 = x.astype(jnp.bfloat16)
    params_bf16 = {n: p.astype(jnp.bfloat16) for n, p in params.items()}
    out_bf16 = jax.block_until_ready(
        linglong_attention(x_bf16, params_bf16, n_head=H, layer_idx=0, mode="dense"))
    assert out_bf16.dtype == jnp.bfloat16
    assert jnp.allclose(out_bf16.astype(jnp.float32), ref_dense,
                        atol=5e-2, rtol=5e-1), "bf16 mismatch"

    # TODO(synk): layer_past / use_cache (KV-cache concat), additive
    # attention_mask bias, output_attentions, and training-mode dropout are not
    # wired into the kernels (forward assumes layer_past=None,
    # attention_mask=None, use_cache=False, eval mode).
    print("KERNEL_OK")
</pallas_src>

<mosaic_0001>
module attributes {stable_mosaic.version = 11 : i64} {
  func.func @_qkv_split_heads_kernel(%arg0: i32, %arg1: i32, %arg2: memref<1x8x32xf32, #tpu.memory_space<vmem>>, %arg3: memref<32x96xf32, #tpu.memory_space<vmem>>, %arg4: memref<1x96xf32, #tpu.memory_space<vmem>>, %arg5: memref<1x4x8x8xf32, #tpu.memory_space<vmem>>, %arg6: memref<1x4x8x8xf32, #tpu.memory_space<vmem>>, %arg7: memref<1x4x8x8xf32, #tpu.memory_space<vmem>>) attributes {dimension_semantics = [#tpu.dimension_semantics<parallel>, #tpu.dimension_semantics<parallel>], iteration_bounds = array<i64: 2, 1>, scalar_prefetch = 0 : i64, scratch_operands = 0 : i64, tpu.core_type = #tpu.core_type<tc>, window_params = [{transform_indices = @transform_0, window_bounds = array<i64: 1, 8, 32>}, {pipeline_mode = #tpu.pipeline_mode<synchronous>, transform_indices = @transform_1, window_bounds = array<i64: 32, 96>}, {pipeline_mode = #tpu.pipeline_mode<synchronous>, transform_indices = @transform_2, window_bounds = array<i64: 1, 96>}, {transform_indices = @transform_3, window_bounds = array<i64: 1, 4, 8, 8>}, {transform_indices = @transform_4, window_bounds = array<i64: 1, 4, 8, 8>}, {transform_indices = @transform_5, window_bounds = array<i64: 1, 4, 8, 8>}]} {
    %c0 = arith.constant 0 : index
    %c0_0 = arith.constant 0 : index
    %c0_1 = arith.constant 0 : index
    %0 = vector.load %arg2[%c0, %c0_0, %c0_1] : memref<1x8x32xf32, #tpu.memory_space<vmem>>, vector<1x8x32xf32>
    %1 = vector.shape_cast %0 : vector<1x8x32xf32> to vector<8x32xf32>
    %c0_2 = arith.constant 0 : index
    %c0_3 = arith.constant 0 : index
    %2 = vector.load %arg3[%c0_2, %c0_3] : memref<32x96xf32, #tpu.memory_space<vmem>>, vector<32x96xf32>
    %cst = arith.constant dense<0.000000e+00> : vector<8x96xf32>
    %3 = tpu.matmul %1, %2, %cst {dimension_numbers = #tpu.dot_dimension_numbers<[1], [0], [0], [1], [0, 0, 1, 1], [], []>} : vector<8x32xf32>, vector<32x96xf32>, vector<8x96xf32> -> vector<8x96xf32>
    %c0_4 = arith.constant 0 : index
    %c0_5 = arith.constant 0 : index
    %4 = vector.load %arg4[%c0_4, %c0_5] : memref<1x96xf32, #tpu.memory_space<vmem>>, vector<1x96xf32>
    %5 = vector.broadcast %4 : vector<1x96xf32> to vector<8x96xf32>
    %6 = arith.addf %3, %5 : vector<8x96xf32>
    %7 = vector.extract_strided_slice %6 {offsets = [0, 0], sizes = [8, 8], strides = [1, 1]} : vector<8x96xf32> to vector<8x8xf32>
    %cst_6 = arith.constant 0.510069728 : f32
    %8 = vector.broadcast %cst_6 : f32 to vector<8x8xf32>
    %9 = arith.mulf %7, %8 : vector<8x8xf32>
    %10 = vector.extract_strided_slice %6 {offsets = [0, 32], sizes = [8, 8], strides = [1, 1]} : vector<8x96xf32> to vector<8x8xf32>
    %11 = tpu.transpose %10, [1, 0] : vector<8x8xf32> -> vector<8x8xf32>
    %12 = vector.extract_strided_slice %6 {offsets = [0, 64], sizes = [8, 8], strides = [1, 1]} : vector<8x96xf32> to vector<8x8xf32>
    %13 = vector.extract_strided_slice %6 {offsets = [0, 8], sizes = [8, 8], strides = [1, 1]} : vector<8x96xf32> to vector<8x8xf32>
    %cst_7 = arith.constant 0.510069728 : f32
    %14 = vector.broadcast %cst_7 : f32 to vector<8x8xf32>
    %15 = arith.mulf %13, %14 : vector<8x8xf32>
    %16 = vector.extract_strided_slice %6 {offsets = [0, 40], sizes = [8, 8], strides = [1, 1]} : vector<8x96xf32> to vector<8x8xf32>
    %17 = tpu.transpose %16, [1, 0] : vector<8x8xf32> -> vector<8x8xf32>
    %18 = vector.extract_strided_slice %6 {offsets = [0, 72], sizes = [8, 8], strides = [1, 1]} : vector<8x96xf32> to vector<8x8xf32>
    %19 = vector.extract_strided_slice %6 {offsets = [0, 16], sizes = [8, 8], strides = [1, 1]} : vector<8x96xf32> to vector<8x8xf32>
    %cst_8 = arith.constant 0.510069728 : f32
    %20 = vector.broadcast %cst_8 : f32 to vector<8x8xf32>
    %21 = arith.mulf %19, %20 : vector<8x8xf32>
    %22 = vector.extract_strided_slice %6 {offsets = [0, 48], sizes = [8, 8], strides = [1, 1]} : vector<8x96xf32> to vector<8x8xf32>
    %23 = tpu.transpose %22, [1, 0] : vector<8x8xf32> -> vector<8x8xf32>
    %24 = vector.extract_strided_slice %6 {offsets = [0, 80], sizes = [8, 8], strides = [1, 1]} : vector<8x96xf32> to vector<8x8xf32>
    %25 = vector.extract_strided_slice %6 {offsets = [0, 24], sizes = [8, 8], strides = [1, 1]} : vector<8x96xf32> to vector<8x8xf32>
    %cst_9 = arith.constant 0.510069728 : f32
    %26 = vector.broadcast %cst_9 : f32 to vector<8x8xf32>
    %27 = arith.mulf %25, %26 : vector<8x8xf32>
    %28 = vector.extract_strided_slice %6 {offsets = [0, 56], sizes = [8, 8], strides = [1, 1]} : vector<8x96xf32> to vector<8x8xf32>
    %29 = tpu.transpose %28, [1, 0] : vector<8x8xf32> -> vector<8x8xf32>
    %30 = vector.extract_strided_slice %6 {offsets = [0, 88], sizes = [8, 8], strides = [1, 1]} : vector<8x96xf32> to vector<8x8xf32>
    %31 = vector.shape_cast %9 : vector<8x8xf32> to vector<1x8x8xf32>
    %32 = vector.shape_cast %15 : vector<8x8xf32> to vector<1x8x8xf32>
    %33 = vector.shape_cast %21 : vector<8x8xf32> to vector<1x8x8xf32>
    %34 = vector.shape_cast %27 : vector<8x8xf32> to vector<1x8x8xf32>
    %35 = tpu.concatenate %31, %32, %33, %34 in 0 : vector<1x8x8xf32>, vector<1x8x8xf32>, vector<1x8x8xf32>, vector<1x8x8xf32> -> vector<4x8x8xf32>
    %c0_10 = arith.constant 0 : index
    %c0_11 = arith.constant 0 : index
    %c0_12 = arith.constant 0 : index
    %c0_13 = arith.constant 0 : index
    %36 = vector.load %arg5[%c0_10, %c0_11, %c0_12, %c0_13] : memref<1x4x8x8xf32, #tpu.memory_space<vmem>>, vector<1x4x8x8xf32>
    %37 = vector.shape_cast %36 : vector<1x4x8x8xf32> to vector<4x8x8xf32>
    %38 = vector.shape_cast %35 : vector<4x8x8xf32> to vector<1x4x8x8xf32>
    tpu.vector_store %arg5[%c0_10, %c0_11, %c0_12, %c0_13], %38 {strides = array<i32>} : memref<1x4x8x8xf32, #tpu.memory_space<vmem>>, vector<1x4x8x8xf32>,
    %39 = vector.shape_cast %11 : vector<8x8xf32> to vector<1x8x8xf32>
    %40 = vector.shape_cast %17 : vector<8x8xf32> to vector<1x8x8xf32>
    %41 = vector.shape_cast %23 : vector<8x8xf32> to vector<1x8x8xf32>
    %42 = vector.shape_cast %29 : vector<8x8xf32> to vector<1x8x8xf32>
    %43 = tpu.concatenate %39, %40, %41, %42 in 0 : vector<1x8x8xf32>, vector<1x8x8xf32>, vector<1x8x8xf32>, vector<1x8x8xf32> -> vector<4x8x8xf32>
    %c0_14 = arith.constant 0 : index
    %c0_15 = arith.constant 0 : index
    %c0_16 = arith.constant 0 : index
    %c0_17 = arith.constant 0 : index
    %44 = vector.load %arg6[%c0_14, %c0_15, %c0_16, %c0_17] : memref<1x4x8x8xf32, #tpu.memory_space<vmem>>, vector<1x4x8x8xf32>
    %45 = vector.shape_cast %44 : vector<1x4x8x8xf32> to vector<4x8x8xf32>
    %46 = vector.shape_cast %43 : vector<4x8x8xf32> to vector<1x4x8x8xf32>
    tpu.vector_store %arg6[%c0_14, %c0_15, %c0_16, %c0_17], %46 {strides = array<i32>} : memref<1x4x8x8xf32, #tpu.memory_space<vmem>>, vector<1x4x8x8xf32>,
    %47 = vector.shape_cast %12 : vector<8x8xf32> to vector<1x8x8xf32>
    %48 = vector.shape_cast %18 : vector<8x8xf32> to vector<1x8x8xf32>
    %49 = vector.shape_cast %24 : vector<8x8xf32> to vector<1x8x8xf32>
    %50 = vector.shape_cast %30 : vector<8x8xf32> to vector<1x8x8xf32>
    %51 = tpu.concatenate %47, %48, %49, %50 in 0 : vector<1x8x8xf32>, vector<1x8x8xf32>, vector<1x8x8xf32>, vector<1x8x8xf32> -> vector<4x8x8xf32>
    %c0_18 = arith.constant 0 : index
    %c0_19 = arith.constant 0 : index
    %c0_20 = arith.constant 0 : index
    %c0_21 = arith.constant 0 : index
    %52 = vector.load %arg7[%c0_18, %c0_19, %c0_20, %c0_21] : memref<1x4x8x8xf32, #tpu.memory_space<vmem>>, vector<1x4x8x8xf32>
    %53 = vector.shape_cast %52 : vector<1x4x8x8xf32> to vector<4x8x8xf32>
    %54 = vector.shape_cast %51 : vector<4x8x8xf32> to vector<1x4x8x8xf32>
    tpu.vector_store %arg7[%c0_18, %c0_19, %c0_20, %c0_21], %54 {strides = array<i32>} : memref<1x4x8x8xf32, #tpu.memory_space<vmem>>, vector<1x4x8x8xf32>,
    return
  }
  func.func @transform_0(%arg0: i32, %arg1: i32) -> (i32, i32, i32) {
    %c0_i32 = arith.constant 0 : i32
    %c0_i32_0 = arith.constant 0 : i32
    return %arg0, %arg1, %c0_i32 : i32, i32, i32
  }
  func.func @transform_1(%arg0: i32, %arg1: i32) -> (i32, i32) {
    %c0_i32 = arith.constant 0 : i32
    %c0_i32_0 = arith.constant 0 : i32
    %c0_i32_1 = arith.constant 0 : i32
    return %c0_i32, %c0_i32_0 : i32, i32
  }
  func.func @transform_2(%arg0: i32, %arg1: i32) -> (i32, i32) {
    %c0_i32 = arith.constant 0 : i32
    %c0_i32_0 = arith.constant 0 : i32
    %c0_i32_1 = arith.constant 0 : i32
    return %c0_i32, %c0_i32_0 : i32, i32
  }
  func.func @transform_3(%arg0: i32, %arg1: i32) -> (i32, i32, i32, i32) {
    %c0_i32 = arith.constant 0 : i32
    %c0_i32_0 = arith.constant 0 : i32
    %c0_i32_1 = arith.constant 0 : i32
    return %arg0, %c0_i32, %arg1, %c0_i32_0 : i32, i32, i32, i32
  }
  func.func @transform_4(%arg0: i32, %arg1: i32) -> (i32, i32, i32, i32) {
    %c0_i32 = arith.constant 0 : i32
    %c0_i32_0 = arith.constant 0 : i32
    %c0_i32_1 = arith.constant 0 : i32
    return %arg0, %c0_i32, %c0_i32_0, %arg1 : i32, i32, i32, i32
  }
  func.func @transform_5(%arg0: i32, %arg1: i32) -> (i32, i32, i32, i32) {
    %c0_i32 = arith.constant 0 : i32
    %c0_i32_0 = arith.constant 0 : i32
    %c0_i32_1 = arith.constant 0 : i32
    return %arg0, %c0_i32, %arg1, %c0_i32_0 : i32, i32, i32, i32
  }
}

</mosaic_0001>

<bundles_post_ra>
// kernel: tpu_custom_call.1
= control target key start
LH: loop header
LB: loop body
LE: loop exit
PB: predicated region body
PF: predicated region fallthrough
CT: control target
= control target key end

     0   :  { %11 = vsyncpa [#allocation3], 0  ;;  %s1516_s0 = inlined_call_operand.hbm [shape: f32[2,8,32], index: 0, kind: input, shape index: {}]   ;;  %s1517_s1 = inlined_call_operand.hbm [shape: f32[32,96], index: 1, kind: input, shape index: {}]   ;;  %s1518_s2 = inlined_call_operand.vmem [shape: f32[1,96], index: 2, kind: input, shape index: {}]   ;;  %s1519_s3 = inlined_call_operand.hbm [shape: f32[2,4,8,8], index: 3, kind: output, shape index: {0}]   ;;  %s1520_s4 = inlined_call_operand.hbm [shape: f32[2,4,8,8], index: 4, kind: output, shape index: {1}]   ;;  %s1521_s5 = inlined_call_operand.hbm [shape: f32[2,4,8,8], index: 5, kind: output, shape index: {2}]  }
   0x1   :  { %13 = vsyncpa [#allocation3 + $0x1], 0 }
   0x2   :  { %14 = vsyncpa [#allocation6], 0 }
   0x3   :  { %15 = vsyncpa [#allocation4], 0 }
   0x4   :  { %17 = vsyncpa [#allocation4 + $0x1], 0 }
   0x5   :  { %18 = vsyncpa [#allocation9], 0 }
   0x6   :  { %20 = vsyncpa [#allocation9 + $0x1], 0  ;;  %s1186_s18 = smov 0   ;;  %s1188_s19 = smov 0  }
   0x7   :  { %s1190_s20 = smov 0   ;;  %s1192_s21 = smov 0  }
   0x8   :  { %s1194_s22 = smov 0   ;;  %s1196_s23 = smov 0  }
   0x9 LB: > { %s1217_s24 = sadd.s32 4294967295, %s1134_s23   ;;  %s1525_s25 = sadd.s32 4294967294, %s1134_s23   ;;  %s1134_s23 = sphi %s1196_s23, %s26_s23   ;;  %s1130_s22 = sphi %s1194_s22, %s1547_s22   ;;  %s1126_s21 = sphi %s1192_s21, %s1546_s21   ;;  %s1122_s20 = sphi %s1190_s20, %s1545_s20   ;;  %s1118_s19 = sphi %s1188_s19, %s1544_s19   ;;  %s1114_s18 = sphi %s1186_s18, %s1543_s18  }
   0xa   : > { %p60_p0 = scmp.ne.s32.totalorder %s1118_s19, %s1114_s18  ;;  %p1522_p1 = scmp.eq.s32.totalorder %s1217_s24, 0 }
   0xb   : > { %p134_p3 = scmp.eq.s32.totalorder %s1525_s25, 1  ;;  %p783_p5 = scmp.ge.s32.totalorder %s1134_s23, 1 }
   0xc   : > { %p1228_p4 = por %p1522_p1, %p60_p0  ;;  %p197_p7 = scmp.lt.s32.totalorder %s1134_s23, 3 }
   0xd   : > { %p1233_p6 = por %p134_p3, %p60_p0  ;;  %s1136_s29 = smov [#allocation5]  }
   0xe   : > { %s1527_s26 = scalar_select %p1228_p4, 1, 0 }
   0xf   : > { %s1528_s27 = scalar_select %p1233_p6, 1, 0 }
  0x10   : > { %p1238_p8 = pnand %p783_p5, %p197_p7  ;;  %s209_s30 = sshll.u32 %s1136_s29, 4  ;;  %s210_s30 = int_to_ptr.vmem [resolvable:$true] %s209_s30 }
  0x11   : > { %s38_s7 = sadd.s32 1, %s1130_s22  ;;  %s930_s10 = scalar_lea.hbm %s1517_s1, 512 }
  0x12   : > { %s1529_s28 = scalar_select %p1238_p8, 1, 0 }
  0x13   : > { %p844_p9 = pneg %p1238_p8  ;;  %p931_p12 = scmp.ne.s32.totalorder %s1517_s1, %s930_s10 }
  0x14   : > { %p937_p5 = scmp.lt.u32.totalorder %s930_s10, %s1517_s1 }
  0x15   : > { %p1247_p11 = pnand %p844_p9, %p1522_p1 }
  0x17   : > { %p932_p13 = pneg %p1247_p11 }
  0x19   : > { %p933_p0 = pnand %p932_p13, %p931_p12 }
  0x1b   : > { %p934_p3 = pneg %p933_p0 }
  0x1d   : > { %p939_p7 = pnand %p937_p5, %p934_p3 }
  0x1f   : > { %942 = shalt.err (!%p939_p7)
}
  0x20   : > { %s943_s15 = scalar_lea.vmem %s210_s30, 512  ;;  %p951_p2 = scmp.lt.s32.totalorder %s210_s30, %s210_s30 }
  0x21   : > { %p944_p9 = scmp.ne.s32.totalorder %s210_s30, %s943_s15  ;;  %p952_p6 = scmp.lt.s32.totalorder %s943_s15, %s943_s15 }
  0x23   : > { %p946_p10 = pnand %p944_p9, %p932_p13  ;;  %p953_p4 = por %p952_p6, %p951_p2 }
  0x25   : > { %p947_p1 = pneg %p946_p10 }
  0x27   : > { %p954_p8 = pnand %p953_p4, %p947_p1 }
  0x29   : > { %957 = shalt.err (!%p954_p8)
}
  0x2a   : > { %s1137_s16 = smov 128   ;;  %s1138_s17 = smov 8  }
  0x2b   : > { %847 = dma.hbm_to_vmem [thread:$0]  (!%p1247_p11), %s1517_s1, 512, %s210_s30, [#allocation6], %s1137_s16, %s1137_s16, %s1138_s17  }
  0x2c   : > { %p40_p1 = scmp.ge.s32.totalorder %s38_s7, 2  ;;  %s47_s9 = sadd.s32 1, %s1122_s20 }
  0x2d   : > { %p54_p2 = scmp.ne.s32.totalorder %s1122_s20, %s1118_s19  ;;  %p55_p4 = scmp.eq.s32.totalorder %s1134_s23, 0 }
  0x2e   : > { %s1549_s7 = smov (%p40_p1, %s38_s7), 0  ;;  %p1532_p8 = scmp.eq.s32.totalorder %s1217_s24, 1 }
  0x2f   : > { %p1274_p6 = por %p55_p4, %p54_p2  ;;  %s42_s6 = ssub.s32 %s1130_s22, %s1549_s7 }
  0x30   : > { %p1280_p10 = por %p1532_p8, %p54_p2  ;;  %p863_p12 = scmp.lt.s32.totalorder %s1134_s23, 2 }
  0x31   : > { %p45_p11 = scmp.eq.s32.totalorder %s42_s6, 0  ;;  %s226_s30 = sand.u32 1, %s1122_s20  }
  0x32   : > { %s786_s12 = sshll.u32 %s226_s30, 3  ;;  %s787_s14 = sshll.u32 %s1130_s22, 7 }
  0x33   : > { %s1289_s13 = scalar_select %p45_p11, %s1122_s20, %s47_s9  }
  0x34   : > { %s1295_s17 = scalar_lea.hbm %s1516_s0, %s787_s14  ;;  %s230_s29 = scalar_lea.vmem [#allocation2], %s786_s12 }
  0x35   : > { %s238_s8 = sshll.u32 %s230_s29, 4  ;;  %p1301_p13 = pnand %p863_p12, %p1274_p6  ;;  %s1297_s8 = int_to_ptr.vmem [resolvable:$true] %s238_s8 }
  0x36   : > { %s227_s9 = scalar_lea.sflag [#allocation3], %s226_s30  ;;  %s958_s25 = scalar_lea.hbm %s1295_s17, 128 }
  0x37   : > { %p959_p0 = scmp.ne.s32.totalorder %s1295_s17, %s958_s25  ;;  %p960_p3 = pneg %p1301_p13 }
  0x38   : > { %s963_s15 = scalar_lea.hbm %s1516_s0, 256  ;;  %p964_p9 = scmp.lt.u32.totalorder %s1295_s17, %s1516_s0 }
  0x39   : > { %p961_p5 = pnand %p960_p3, %p959_p0  ;;  %p965_p1 = scmp.lt.u32.totalorder %s963_s15, %s958_s25 }
  0x3a   : > { %p967_p4 = scmp.lt.u32.totalorder %s958_s25, %s1295_s17 }
  0x3b   : > { %p962_p7 = pneg %p961_p5  ;;  %p966_p2 = por %p965_p1, %p964_p9 }
  0x3d   : > { %p968_p6 = por %p967_p4, %p966_p2 }
  0x3f   : > { %p969_p8 = pnand %p968_p6, %p962_p7 }
  0x41   : > { %972 = shalt.err (!%p969_p8)
}
  0x42   : > { %s973_s30 = scalar_lea.vmem %s1297_s8, 128  ;;  %s1139_s29 = smov [#allocation2]  }
  0x43   : > { %p974_p12 = scmp.ne.s32.totalorder %s1297_s8, %s973_s30  ;;  %s978_s12 = sshll.u32 %s1139_s29, 4  ;;  %s979_s12 = int_to_ptr.vmem [resolvable:$false] %s978_s12 }
  0x44   : > { %s980_s14 = scalar_lea.vmem %s979_s12, 256  ;;  %p981_p5 = scmp.lt.s32.totalorder %s1297_s8, %s979_s12 }
  0x45   : > { %p976_p11 = pnand %p974_p12, %p960_p3  ;;  %p982_p9 = scmp.lt.s32.totalorder %s980_s14, %s973_s30 }
  0x47   : > { %p977_p0 = pneg %p976_p11  ;;  %p983_p1 = por %p982_p9, %p981_p5 }
  0x49   : > { %p984_p2 = pnand %p983_p1, %p977_p0 }
  0x4b   : > { %987 = shalt.err (!%p984_p2)
}
  0x4c   : > { %851 = dma.hbm_to_vmem [thread:$0]  (!%p1301_p13), %s1295_s17, 128, %s1297_s8, %s227_s9  }
  0x4d   : > { %p1535_p7 = scmp.ne.s32.totalorder %s1529_s28, 0 }
  0x4e   : > { %s1333_s25 = sand.u32 (!%p1535_p7), 1, %s1118_s19   ;;  %p1536_p3 = scmp.ne.s32.totalorder (!%p1535_p7), %s1527_s26, 0 }
  0x4f   : > { %247 = sbr.rel (%p1535_p7) target bundleno = 616 (0x268), region = 32  ;;  %s789_s15 = sshll.u32 (!%p1535_p7), %s1333_s25, 3 }
  0x50   : > { %s250_s10 = scalar_lea.sflag (!%p1535_p7), [#allocation3], %s1333_s25  ;;  %s253_s16 = scalar_lea.vmem (!%p1535_p7), [#allocation2], %s789_s15 }
  0x56   : > { %1097 = dma.done.wait (%p1536_p3), %s250_s10, 128  }
  0x57   : > { %1099 = vsyncadd (%p1536_p3), %s250_s10, 4294967168  ;;  %p1537_p4 = scmp.eq.s32.totalorder %s1217_s24, 0 }
  0x59   : > { %1101 = dma.done.wait (%p1537_p4), [#allocation6], 512   ;;  %p1538_p13 = pmov %p1537_p4 }
  0x5a   : > { %v1140_v0 = vmov 0.0|0.0   ;;  %vm1141_vm0 = vmmov 0   ;;  %v1142_v1 = vmov 0.0   ;;  %v295_v2 = vld [vmem:[#allocation5] sm:$0xff]  ;;  %v296_v3 = vld [vmem:[#allocation5 + $0x8] sm:$0xff]  ;;  %v297_v4 = vld [vmem:[#allocation5 + $0x10] sm:$0xff] }
  0x5b   : > { %1103 = vsyncadd (%p1538_p13), [#allocation6], 4294966784  ;;  %826 = vmatprep.subr.bf16.mxu0 %v1140_v0  ;;  %823 = vmatprep.mubr.msk.f32.mxu0 %vm1141_vm0, %v1142_v1  ;;  %v827_v5 = vpack.c.bf16 %v296_v3, %v295_v2  ;;  %v298_v6 = vld [vmem:[#allocation5 + $0x18] sm:$0xff]  ;;  %vm306_vm1 = vcmask 261120   ;;  %v794_v9 = vld [vmem:[%s1518_s2] ss:$0 sm:$0xff] }
  0x5c   : > { %v830_v7 = vpack.c.bf16 %v298_v6, %v297_v4  ;;  %v294_v8 = vld [vmem:[%s253_s16] sm:$0xff]  ;;  %s1349_s17 = sshll.u32 %s1333_s25, 5  ;;  %vm532_vm2 = vcmask 64512   ;;  %s1143_s8 = smov 88  }
  0x5d   : > { %828 = vmatpush3.bf16.msra.mxu0 %v827_v5  ;;  %s1144_s6 = smov 96   ;;  %s1352_s9 = scalar_lea.vmem [#allocation7], %s1349_s17 }
  0x5e   : > { %829 = vmatprep.subr.bf16.mxu0 %v1140_v0  ;;  %s1145_s30 = smov 112   ;;  %s1146_s29 = smov 120  }
  0x5f   : > { %s1147_s12 = smov 80   ;;  %s1148_s14 = smov 104  }
  0x60   : > { %s1149_s15 = smov 72   ;;  %s1526_s10 = smov 64  }
  0x61   : > { %831 = vmatpush3.bf16.msra.mxu0 %v830_v7  ;;  %s1360_s16 = scalar_lea.vmem [#allocation10], %s1349_s17  ;;  %s588_s26 = sshll.u32 %s1352_s9, 4  ;;  %s1370_s26 = int_to_ptr.vmem [resolvable:$true] %s588_s26 }
  0x62   : > { %s1373_s28 = sshll.u32 %s1126_s21, 9 }
  0x64   : > { %824 = vmatmul.mubr.msk.f32.vlgmr.msra.gmra.mrb[0].mxu0 %vm306_vm1, %v294_v8 }
 0x137   : > { %v376_v10 = vpop.f32.mrb[0].mxu0 }
 0x138   : > { %v377_v11 = vadd.f32 %v794_v9, %v376_v10  ;;  %v825_v12 = vpop.f32.mrb[1].mxu0 }
 0x13a   : > { %417 = vrot.lane.b32.xlu1 %v377_v11, %s1143_s8  ;;  %382 = vrot.lane.b32.xlu0 %v377_v11, %s1144_s6  ;;  %v380_v13 = vmul.f32 0.5100697, %v377_v11 }
 0x13c   : > { %533 = vst.msk [vmem:[%s1352_s9] sm:$0xff] %vm532_vm2, %v380_v13 }
 0x13e   : > { %543 = vrot.lane.b32.xlu1 %v377_v11, %s1145_s30  ;;  %541 = vrot.lane.b32.xlu0 %v377_v11, %s1146_s29 }
 0x142   : > { %452 = vrot.lane.b32.xlu1 %v377_v11, %s1147_s12  ;;  %545 = vrot.lane.b32.xlu0 %v377_v11, %s1148_s14  ;;  %s988_s12 = scalar_lea.vmem %s1370_s26, 512 }
 0x143   : > { %p989_p6 = scmp.ne.s32.totalorder %s1370_s26, %s988_s12 }
 0x145   : > { %p990_p8 = pnand %p989_p6, %p1280_p10 }
 0x146   : > { %487 = vrot.lane.b32.xlu0 %v377_v11, %s1149_s15  ;;  %526 = vrot.lane.b32.xlu1 %v380_v13, %s1145_s30  ;;  %s1380_s30 = scalar_lea.hbm %s1519_s3, %s1373_s28 }
 0x147   : > { %p991_p12 = pneg %p990_p8 }
 0x14a   : > { %547 = vrot.lane.b32.xlu0 %v377_v11, %s1526_s10  ;;  %529 = vrot.lane.b32.xlu1 %v380_v13, %s1148_s14 }
 0x14e   : > { %523 = vrot.lane.b32.xlu0 %v380_v13, %s1146_s29  ;;  %s564_s29 = scalar_lea.sflag [#allocation4], %s1333_s25 }
 0x1ac   : > { %v418_v14 = vpop.permute.xlu1 %417  ;;  %v383_v15 = vpop.permute.xlu0 %382 }
 0x1ad   : > { %420 = vxpose.xlu1.b32.start.end [1/1] (short) (narrow) %v418_v14, 8  ;;  %385 = vxpose.xlu0.b32.start.end [1/1] (short) (narrow) %v383_v15, 8 }
 0x1b0   : > { %v544_v16 = vpop.permute.xlu1 %543  ;;  %v542_v17 = vpop.permute.xlu0 %541 }
 0x1b4   : > { %v453_v18 = vpop.permute.xlu1 %452  ;;  %v546_v19 = vpop.permute.xlu0 %545 }
 0x1b5   : > { %455 = vxpose.xlu1.b32.start.end [1/1] (short) (narrow) %v453_v18, 8 }
 0x1b8   : > { %v488_v20 = vpop.permute.xlu0 %487  ;;  %v527_v21 = vpop.permute.xlu1 %526 }
 0x1b9   : > { %535 = vst.msk [vmem:[%s1352_s9 + $0x10] sm:$0xff] %vm532_vm2, %v527_v21  ;;  %490 = vxpose.xlu0.b32.start.end [1/1] (short) (narrow) %v488_v20, 8 }
 0x1bc   : > { %v548_v22 = vpop.permute.xlu0 %547  ;;  %v530_v23 = vpop.permute.xlu1 %529 }
 0x1bd   : > { %559 = vst.msk [vmem:[%s1360_s16] sm:$0xff] %vm532_vm2, %v548_v22  ;;  %536 = vst.msk [vmem:[%s1352_s9 + $0x18] sm:$0xff] %vm532_vm2, %v530_v23 }
 0x1c0   : > { %v524_v24 = vpop.permute.xlu0 %523 }
 0x1c1   : > { %534 = vst.msk [vmem:[%s1352_s9 + $0x8] sm:$0xff] %vm532_vm2, %v524_v24  ;;  %s1151_s9 = smov [#allocation7]  }
 0x1c2   : > { %s992_s14 = sshll.u32 %s1151_s9, 4  ;;  %s993_s14 = int_to_ptr.vmem [resolvable:$false] %s992_s14 }
 0x1c3   : > { %s994_s15 = scalar_lea.vmem %s993_s14, 1024  ;;  %p995_p11 = scmp.lt.s32.totalorder %s1370_s26, %s993_s14 }
 0x1c4   : > { %p996_p0 = scmp.lt.s32.totalorder %s994_s15, %s988_s12 }
 0x1c6   : > { %p997_p5 = por %p996_p0, %p995_p11 }
 0x1c8   : > { %p998_p9 = pnand %p997_p5, %p991_p12 }
 0x1d3   : > { %549 = vrot.lane.b32.xlu1 %v542_v17, %s1526_s10 }
 0x1d7   : > { %553 = vrot.lane.b32.xlu1 %v546_v19, %s1526_s10 }
 0x1d8   : > { %1001 = shalt.err (!%p998_p9)
}
 0x1d9   : > { %s1002_s21 = scalar_lea.hbm %s1380_s30, 512  ;;  %s1006_s9 = scalar_lea.hbm %s1519_s3, 1024 }
 0x1da   : > { %p1003_p1 = scmp.ne.s32.totalorder %s1380_s30, %s1002_s21  ;;  %p1007_p3 = scmp.lt.u32.totalorder %s1380_s30, %s1519_s3 }
 0x1db   : > { %p1008_p4 = scmp.lt.u32.totalorder %s1006_s9, %s1002_s21  ;;  %p1010_p6 = scmp.lt.u32.totalorder %s1002_s21, %s1380_s30 }
 0x1dc   : > { %p1004_p2 = pnand %p1003_p1, %p1280_p10 }
 0x1dd   : > { %p1009_p13 = por %p1008_p4, %p1007_p3 }
 0x1de   : > { %p1005_p7 = pneg %p1004_p2 }
 0x1df   : > { %p1011_p8 = por %p1010_p6, %p1009_p13 }
 0x1e1   : > { %p1012_p12 = pnand %p1011_p8, %p1005_p7 }
 0x1e3   : > { %1015 = shalt.err (!%p1012_p12)
}
 0x1e4   : > { %s1152_s12 = smov 128   ;;  %s1153_s15 = smov 8  }
 0x1e5   : > { %838 = dma.vmem_to_hbm [thread:$0]  (%p1280_p10), %s1370_s26, 512, %s1380_s30, %s564_s29, %s1152_s12, %s1152_s12, %s1153_s15  }
 0x1e6   : > { %s1539_s10 = smov 64   ;;  %s286_s21 = scalar_lea.vmem [#allocation8], %s1349_s17 }
 0x1e7   : > { %551 = vrot.lane.b32.xlu0 %v544_v16, %s1539_s10  ;;  %s605_s8 = sshll.u32 %s286_s21, 4  ;;  %s568_s6 = sand.u32 1, %s1217_s24   ;;  %s1415_s8 = int_to_ptr.vmem [resolvable:$true] %s605_s8 }
 0x1e8   : > { %s1421_s26 = scalar_lea.hbm %s1520_s4, %s1373_s28  ;;  %s1424_s17 = scalar_lea.sflag [#allocation9], %s568_s6 }
 0x1e9   : > { %s1016_s30 = scalar_lea.vmem %s1415_s8, 512  ;;  %s1154_s24 = smov [#allocation8]  }
 0x1ea   : > { %p1017_p11 = scmp.ne.s32.totalorder %s1415_s8, %s1016_s30  ;;  %s1020_s29 = sshll.u32 %s1154_s24, 4  ;;  %s1021_s29 = int_to_ptr.vmem [resolvable:$false] %s1020_s29 }
 0x1eb   : > { %s1022_s14 = scalar_lea.vmem %s1021_s29, 1024  ;;  %p1023_p9 = scmp.lt.s32.totalorder %s1415_s8, %s1021_s29 }
 0x1ec   : > { %p1018_p0 = pnand %p1017_p11, %p1280_p10  ;;  %p1024_p1 = scmp.lt.s32.totalorder %s1022_s14, %s1016_s30 }
 0x1ee   : > { %p1019_p5 = pneg %p1018_p0  ;;  %p1025_p2 = por %p1024_p1, %p1023_p9 }
 0x1f0   : > { %p1026_p7 = pnand %p1025_p2, %p1019_p5 }
 0x22d   : > { %v436_v25 = vpop.trf.xlu1  ;;  %v401_v26 = vpop.trf.xlu0 }
 0x22e   : > { %538 = vst.msk [vmem:[%s286_s21 + $0x8] sm:$0xff] %vm532_vm2, %v436_v25  ;;  %537 = vst.msk [vmem:[%s286_s21] sm:$0xff] %vm532_vm2, %v401_v26 }
 0x235   : > { %v471_v27 = vpop.trf.xlu1 }
 0x236   : > { %539 = vst.msk [vmem:[%s286_s21 + $0x10] sm:$0xff] %vm532_vm2, %v471_v27 }
 0x239   : > { %v506_v28 = vpop.trf.xlu0 }
 0x23a   : > { %540 = vst.msk [vmem:[%s286_s21 + $0x18] sm:$0xff] %vm532_vm2, %v506_v28 }
 0x23b   : > { %1029 = shalt.err (!%p1026_p7)
}
 0x23c   : > { %s1030_s10 = scalar_lea.hbm %s1421_s26, 512  ;;  %s1034_s9 = scalar_lea.hbm %s1520_s4, 1024 }
 0x23d   : > { %p1031_p3 = scmp.ne.s32.totalorder %s1421_s26, %s1030_s10  ;;  %p1035_p6 = scmp.lt.u32.totalorder %s1421_s26, %s1520_s4 }
 0x23e   : > { %p1036_p8 = scmp.lt.u32.totalorder %s1034_s9, %s1030_s10  ;;  %p1038_p11 = scmp.lt.u32.totalorder %s1030_s10, %s1421_s26 }
 0x23f   : > { %p1032_p4 = pnand %p1031_p3, %p1280_p10 }
 0x240   : > { %p1037_p12 = por %p1036_p8, %p1035_p6 }
 0x241   : > { %p1033_p13 = pneg %p1032_p4 }
 0x242   : > { %p1039_p0 = por %p1038_p11, %p1037_p12 }
 0x244   : > { %p1040_p5 = pnand %p1039_p0, %p1033_p13 }
 0x246   : > { %1043 = shalt.err (!%p1040_p5)
}
 0x247   : > { %839 = dma.vmem_to_hbm [thread:$0]  (%p1280_p10), %s1415_s8, 512, %s1421_s26, %s1424_s17, %s1152_s12, %s1152_s12, %s1153_s15   ;;  %v550_v29 = vpop.permute.xlu1 %549 }
 0x248   : > { %560 = vst.msk [vmem:[%s1360_s16 + $0x8] sm:$0xff] %vm532_vm2, %v550_v29  ;;  %s622_s30 = sshll.u32 %s1360_s16, 4  ;;  %s1462_s10 = scalar_lea.hbm %s1521_s5, %s1373_s28  ;;  %s1456_s30 = int_to_ptr.vmem [resolvable:$true] %s622_s30 }
 0x249   : > { %s1044_s8 = scalar_lea.vmem %s1456_s30, 512  ;;  %s1155_s26 = smov [#allocation10]  }
 0x24a   : > { %p1045_p9 = scmp.ne.s32.totalorder %s1456_s30, %s1044_s8  ;;  %s1048_s21 = sshll.u32 %s1155_s26, 4  ;;  %s1049_s21 = int_to_ptr.vmem [resolvable:$false] %s1048_s21 }
 0x24b   : > { %v554_v30 = vpop.permute.xlu1 %553  ;;  %s1050_s6 = scalar_lea.vmem %s1049_s21, 1024  ;;  %p1051_p7 = scmp.lt.s32.totalorder %s1456_s30, %s1049_s21 }
 0x24c   : > { %562 = vst.msk [vmem:[%s1360_s16 + $0x18] sm:$0xff] %vm532_vm2, %v554_v30  ;;  %p1046_p1 = pnand %p1045_p9, %p1280_p10  ;;  %p1052_p3 = scmp.lt.s32.totalorder %s1050_s6, %s1044_s8 }
 0x24e   : > { %p1047_p2 = pneg %p1046_p1  ;;  %p1053_p4 = por %p1052_p3, %p1051_p7 }
 0x250   : > { %p1054_p13 = pnand %p1053_p4, %p1047_p2 }
 0x259   : > { %v552_v31 = vpop.permute.xlu0 %551 }
 0x25a   : > { %561 = vst.msk [vmem:[%s1360_s16 + $0x10] sm:$0xff] %vm532_vm2, %v552_v31 }
 0x25b   : > { %1057 = shalt.err (!%p1054_p13)
}
 0x25c   : > { %s1058_s16 = scalar_lea.hbm %s1462_s10, 512  ;;  %s1062_s25 = scalar_lea.hbm %s1521_s5, 1024 }
 0x25d   : > { %p1059_p6 = scmp.ne.s32.totalorder %s1462_s10, %s1058_s16  ;;  %p1063_p11 = scmp.lt.u32.totalorder %s1462_s10, %s1521_s5 }
 0x25e   : > { %p1064_p0 = scmp.lt.u32.totalorder %s1062_s25, %s1058_s16  ;;  %p1066_p9 = scmp.lt.u32.totalorder %s1058_s16, %s1462_s10 }
 0x25f   : > { %p1060_p8 = pnand %p1059_p6, %p1280_p10 }
 0x260   : > { %p1065_p5 = por %p1064_p0, %p1063_p11 }
 0x261   : > { %p1061_p12 = pneg %p1060_p8 }
 0x262   : > { %p1067_p1 = por %p1066_p9, %p1065_p5 }
 0x264   : > { %p1068_p2 = pnand %p1067_p1, %p1061_p12 }
 0x266   : > { %1071 = shalt.err (!%p1068_p2)
}
 0x267   : > { %840 = dma.vmem_to_hbm [thread:$0]  (%p1280_p10), %s1456_s30, 512, %s1462_s10, %s1424_s17, %s1152_s12, %s1152_s12, %s1153_s15  }
 0x268 PF: > { %s637_s14 = sand.u32 1, %s1114_s18   ;;  %p1540_p7 = scmp.ne.s32.totalorder %s1528_s27, 0 }
 0x269   : > { %p1541_p3 = scmp.ge.s32.totalorder %s1134_s23, 2  ;;  %s638_s8 = scalar_lea.sflag [#allocation4], %s637_s14 }
 0x26b   : > { %p853_p4 = pnand %p1541_p3, %p1540_p7 }
 0x26d   : > { %1105 = dma.done.wait (!%p853_p4), %s638_s8, 512  }
 0x26e   : > { %1107 = vsyncadd (!%p853_p4), %s638_s8, 4294966784  ;;  %s1542_s11 = sadd.s32 4294967294, %s1134_s23  }
 0x26f   : > { %s646_s26 = sand.u32 1, %s1542_s11  }
 0x270   : > { %s647_s21 = scalar_lea.sflag [#allocation9], %s646_s26 }
 0x271   : > { %1109 = dma.done.wait (!%p853_p4), %s647_s21, 1024  }
 0x272   : > { %1111 = vsyncadd (!%p853_p4), %s647_s21, 4294966272  ;;  %s26_s23 = sadd.s32 1, %s1134_s23   ;;  %s1543_s18 = smov %s1118_s19 }
 0x273   : > { %p23_p10 = scmp.ge.s32.totalorder %s26_s23, 4   ;;  %s1544_s19 = smov %s1122_s20 }
 0x274   : > { %s1545_s20 = smov %s1289_s13  ;;  %s1546_s21 = smov %s1130_s22 }
 0x275   : > { %s1547_s22 = smov %s1549_s7  ;;  %25 = sbr.rel (!%p23_p10) target bundleno = 9 (0x9), region = 113 }
 0x27c   :  { %661 = vsyncpa [#allocation3], 1 }
 0x27d   :  { %663 = vsyncpa [#allocation3 + $0x1], 1 }
 0x27e   :  { %664 = vsyncpa [#allocation6], 1 }
 0x27f   :  { %665 = vsyncpa [#allocation4], 1 }
 0x280   :  { %667 = vsyncpa [#allocation4 + $0x1], 1 }
 0x281   :  { %668 = vsyncpa [#allocation9], 1 }
 0x282   :  { %670 = vsyncpa [#allocation9 + $0x1], 1 }

</bundles_post_ra>
